<compile_context>
chip_gen: v7x
topology: tpu7x:2x2x1
jax: 0.10.0
libtpu: 0.0.40
codegen_flags: <defaults>
</compile_context>

<pallas_src>
import functools

import jax
import jax.numpy as jnp
from jax import lax
from jax.experimental import pallas as pl
from jax.experimental.pallas import tpu as pltpu

COS_WEIGHT = 0.8
COS_EPS = 1e-8


def _weighted_mse_cos_kernel(o_ref, t_ref, out_ref, sq_acc, cos_acc, *,
                             batch, tile_b, tiles_per_core, eps):
    """Grid = (num_cores [parallel], tiles_per_core [arbitrary reduction])."""
    j = pl.program_id(1)

    @pl.when(j == 0)
    def _():
        sq_acc[...] = jnp.zeros_like(sq_acc)
        cos_acc[...] = jnp.zeros_like(cos_acc)

    o = o_ref[...].astype(jnp.float32)
    t = t_ref[...].astype(jnp.float32)

    # Logical global row index of every row in this tile (tail / overrun mask).
    tile_idx = pl.program_id(0) * tiles_per_core + j
    rows = tile_idx * tile_b + lax.broadcasted_iota(jnp.int32, (tile_b, 1), 0)
    valid = rows < batch

    # Per-row reductions over the embedding dim (keepdims -> (tile_b, 1)).
    diff = o - t
    sq_row = jnp.sum(diff * diff, axis=-1, keepdims=True)
    dot = jnp.sum(o * t, axis=-1, keepdims=True)
    o_sq = jnp.sum(o * o, axis=-1, keepdims=True)
    t_sq = jnp.sum(t * t, axis=-1, keepdims=True)

    # cos = dot / max(||o||*||t||, eps) == dot * rsqrt(max(||o||^2*||t||^2, eps^2))
    inv_norm = lax.rsqrt(jnp.maximum(o_sq * t_sq, eps * eps))
    cos = dot * inv_norm

    # Row-wise accumulation; scalar collapse deferred to the epilogue.
    sq_acc[...] += jnp.where(valid, sq_row, 0.0)
    cos_acc[...] += jnp.where(valid, 1.0 - cos, 0.0)

    # Epilogue: one cross-lane/sublane reduce, write this core's partials.
    @pl.when(j == pl.num_programs(1) - 1)
    def _():
        total_sq = jnp.sum(sq_acc[...])
        total_cos = jnp.sum(cos_acc[...])
        sub = lax.broadcasted_iota(jnp.int32, out_ref.shape, 1)
        out_ref[...] = jnp.where(sub == 0, total_sq,
                                 jnp.where(sub == 1, total_cos, 0.0))


def weighted_mse_cos_loss(output, target, *, cos_weight=COS_WEIGHT,
                          eps=COS_EPS, num_cores=2,
                          vmem_budget_bytes=16 * 1024 * 1024):
    assert output.shape == target.shape and output.ndim == 2
    batch, dim = output.shape
    itemsize = jnp.dtype(output.dtype).itemsize

    # ---- Tile sizing: big HBM-friendly batch tiles, bounded by VMEM budget
    # (2 inputs x 2 pipeline buffers), rounded to the dtype's sublane packing.
    pack = max(8, 32 // itemsize)                       # f32:8, bf16:16, int8:32
    row_bytes = dim * itemsize
    want_rows = (2 * 1024 * 1024) // max(row_bytes, 1)  # ~2 MiB per block
    cap_rows = vmem_budget_bytes // (4 * max(row_bytes, 1))
    per_core_rows = pl.cdiv(batch, num_cores)
    tile_b = min(max(want_rows, pack), max(cap_rows, pack), max(per_core_rows, 1))
    tile_b = max(pack, (tile_b // pack) * pack)

    total_tiles = pl.cdiv(batch, tile_b)
    tiles_per_core = pl.cdiv(total_tiles, num_cores)
    grid = (num_cores, tiles_per_core)

    def in_index_map(c, j):
        # Clamp so cores whose share overruns the batch just re-read the last
        # tile; their rows are masked out inside the kernel.
        return (jnp.minimum(c * tiles_per_core + j, total_tiles - 1), 0)

    kernel = functools.partial(
        _weighted_mse_cos_kernel,
        batch=int(batch), tile_b=int(tile_b),
        tiles_per_core=int(tiles_per_core), eps=float(eps))

    partials = pl.pallas_call(
        kernel,
        out_shape=jax.ShapeDtypeStruct((num_cores, 8, 128), jnp.float32),
        grid_spec=pltpu.PrefetchScalarGridSpec(
            num_scalar_prefetch=0,
            grid=grid,
            in_specs=[
                pl.BlockSpec((tile_b, dim), in_index_map),
                pl.BlockSpec((tile_b, dim), in_index_map),
            ],
            out_specs=pl.BlockSpec((1, 8, 128), lambda c, j: (c, 0, 0)),
            scratch_shapes=[
                pltpu.VMEM((tile_b, 1), jnp.float32),   # per-row sum (o-t)^2
                pltpu.VMEM((tile_b, 1), jnp.float32),   # per-row (1 - cos)
            ],
        ),
        compiler_params=pltpu.CompilerParams(
            dimension_semantics=("parallel", "arbitrary"),
            vmem_limit_bytes=32 * 1024 * 1024,
        ),
        cost_estimate=pl.CostEstimate(
            flops=int(8 * batch * dim),
            transcendentals=int(batch),
            bytes_accessed=int(2 * batch * dim * itemsize
                               + num_cores * 8 * 128 * 4),
        ),
    )(output, target)

    # Combine per-core partial sums and apply means/weights (tiny scalar work).
    sq_total = jnp.sum(partials[:, 0, 0])
    cos_total = jnp.sum(partials[:, 1, 0])
    mse = sq_total / jnp.float32(batch * dim)
    cos_loss = cos_total / jnp.float32(batch)
    return (1.0 - cos_weight) * mse + cos_weight * cos_loss


def _reference(output, target, cos_weight=COS_WEIGHT):
    o = output.astype(jnp.float32)
    t = target.astype(jnp.float32)
    mse = jnp.mean((o - t) ** 2)
    dot = jnp.sum(o * t, axis=1)
    denom = jnp.maximum(jnp.linalg.norm(o, axis=1) * jnp.linalg.norm(t, axis=1),
                        COS_EPS)
    cos_loss = jnp.mean(1.0 - dot / denom)
    return (1.0 - cos_weight) * mse + cos_weight * cos_loss


if __name__ == "__main__":
    key = jax.random.PRNGKey(0)
    k1, k2, k3, k4 = jax.random.split(key, 4)

    # Case 1: (batch, embedding_dim) matching the module's forward contract.
    batch, embedding_dim = 16, 128
    output = jax.random.normal(k1, (batch, embedding_dim), dtype=jnp.float32)
    target = jax.random.normal(k2, (batch, embedding_dim), dtype=jnp.float32)
    loss = weighted_mse_cos_loss(output, target)
    jax.block_until_ready(loss)
    ref = _reference(output, target)
    assert jnp.allclose(loss, ref, rtol=1e-5, atol=1e-5), (loss, ref)

    # Case 2: ragged batch -> exercises cdiv grid + tail-row masking.
    output2 = jax.random.normal(k3, (13, 256), dtype=jnp.float32)
    target2 = jax.random.normal(k4, (13, 256), dtype=jnp.float32)
    loss2 = weighted_mse_cos_loss(output2, target2)
    jax.block_until_ready(loss2)
    ref2 = _reference(output2, target2)
    assert jnp.allclose(loss2, ref2, rtol=1e-5, atol=1e-5), (loss2, ref2)

    print("KERNEL_OK")
</pallas_src>

<mosaic_0001>
module attributes {stable_mosaic.version = 11 : i64} {
  func.func @_weighted_mse_cos_kernel(%arg0: i32, %arg1: i32, %arg2: memref<8x128xf32, #tpu.memory_space<vmem>>, %arg3: memref<8x128xf32, #tpu.memory_space<vmem>>, %arg4: memref<1x8x128xf32, #tpu.memory_space<vmem>>, %arg5: memref<8x1xf32, #tpu.memory_space<vmem>>, %arg6: memref<8x1xf32, #tpu.memory_space<vmem>>) attributes {dimension_semantics = [#tpu.dimension_semantics<parallel>, #tpu.dimension_semantics<arbitrary>], iteration_bounds = array<i64: 2, 1>, scalar_prefetch = 0 : i64, scratch_operands = 2 : i64, tpu.core_type = #tpu.core_type<tc>, window_params = [{transform_indices = @transform_0, window_bounds = array<i64: 8, 128>}, {transform_indices = @transform_1, window_bounds = array<i64: 8, 128>}, {transform_indices = @transform_2, window_bounds = array<i64: 1, 8, 128>}]} {
    %c0_i32 = arith.constant 0 : i32
    %0 = arith.cmpi eq, %arg1, %c0_i32 : i32
    %1 = arith.extui %0 : i1 to i32
    %c0_i32_0 = arith.constant 0 : i32
    %2 = arith.cmpi ne, %1, %c0_i32_0 : i32
    scf.if %2 {
      %cst_21 = arith.constant 0.000000e+00 : f32
      %46 = vector.broadcast %cst_21 : f32 to vector<8x1xf32>
      %c0_22 = arith.constant 0 : index
      %c0_23 = arith.constant 0 : index
      %47 = vector.load %arg5[%c0_22, %c0_23] : memref<8x1xf32, #tpu.memory_space<vmem>>, vector<8x1xf32>
      tpu.vector_store %arg5[%c0_22, %c0_23], %46 {strides = array<i32>} : memref<8x1xf32, #tpu.memory_space<vmem>>, vector<8x1xf32>,
      %cst_24 = arith.constant 0.000000e+00 : f32
      %48 = vector.broadcast %cst_24 : f32 to vector<8x1xf32>
      %c0_25 = arith.constant 0 : index
      %c0_26 = arith.constant 0 : index
      %49 = vector.load %arg6[%c0_25, %c0_26] : memref<8x1xf32, #tpu.memory_space<vmem>>, vector<8x1xf32>
      tpu.vector_store %arg6[%c0_25, %c0_26], %48 {strides = array<i32>} : memref<8x1xf32, #tpu.memory_space<vmem>>, vector<8x1xf32>,
    } else {
    }
    %c0 = arith.constant 0 : index
    %c0_1 = arith.constant 0 : index
    %3 = vector.load %arg2[%c0, %c0_1] : memref<8x128xf32, #tpu.memory_space<vmem>>, vector<8x128xf32>
    %c0_2 = arith.constant 0 : index
    %c0_3 = arith.constant 0 : index
    %4 = vector.load %arg3[%c0_2, %c0_3] : memref<8x128xf32, #tpu.memory_space<vmem>>, vector<8x128xf32>
    %c1_i32 = arith.constant 1 : i32
    %5 = arith.muli %arg0, %c1_i32 : i32
    %6 = arith.addi %5, %arg1 : i32
    %c8_i32 = arith.constant 8 : i32
    %7 = arith.muli %6, %c8_i32 : i32
    %8 = tpu.iota {dimensions = array<i32: 0>} : vector<8x1xi32>
    %9 = vector.broadcast %7 : i32 to vector<8x1xi32>
    %10 = arith.addi %9, %8 : vector<8x1xi32>
    %c16_i32 = arith.constant 16 : i32
    %11 = vector.broadcast %c16_i32 : i32 to vector<8x1xi32>
    %12 = arith.cmpi slt, %10, %11 : vector<8x1xi32>
    %13 = arith.subf %3, %4 : vector<8x128xf32>
    %14 = arith.mulf %13, %13 : vector<8x128xf32>
    %cst = arith.constant dense<0.000000e+00> : vector<8xf32>
    %15 = vector.multi_reduction <add>, %14, %cst [1] : vector<8x128xf32> to vector<8xf32>
    %16 = vector.shape_cast %15 : vector<8xf32> to vector<8x1xf32>
    %17 = arith.mulf %3, %4 : vector<8x128xf32>
    %cst_4 = arith.constant dense<0.000000e+00> : vector<8xf32>
    %18 = vector.multi_reduction <add>, %17, %cst_4 [1] : vector<8x128xf32> to vector<8xf32>
    %19 = vector.shape_cast %18 : vector<8xf32> to vector<8x1xf32>
    %20 = arith.mulf %3, %3 : vector<8x128xf32>
    %cst_5 = arith.constant dense<0.000000e+00> : vector<8xf32>
    %21 = vector.multi_reduction <add>, %20, %cst_5 [1] : vector<8x128xf32> to vector<8xf32>
    %22 = vector.shape_cast %21 : vector<8xf32> to vector<8x1xf32>
    %23 = arith.mulf %4, %4 : vector<8x128xf32>
    %cst_6 = arith.constant dense<0.000000e+00> : vector<8xf32>
    %24 = vector.multi_reduction <add>, %23, %cst_6 [1] : vector<8x128xf32> to vector<8xf32>
    %25 = vector.shape_cast %24 : vector<8xf32> to vector<8x1xf32>
    %26 = arith.mulf %22, %25 : vector<8x1xf32>
    %cst_7 = arith.constant 1.000000e-16 : f32
    %27 = vector.broadcast %cst_7 : f32 to vector<8x1xf32>
    %28 = arith.maximumf %26, %27 : vector<8x1xf32>
    %29 = math.rsqrt %28 : vector<8x1xf32>
    %30 = arith.mulf %19, %29 : vector<8x1xf32>
    %c0_8 = arith.constant 0 : index
    %c0_9 = arith.constant 0 : index
    %31 = vector.load %arg5[%c0_8, %c0_9] : memref<8x1xf32, #tpu.memory_space<vmem>>, vector<8x1xf32>
    %cst_10 = arith.constant 0.000000e+00 : f32
    %32 = vector.broadcast %cst_10 : f32 to vector<8x1xf32>
    %33 = arith.select %12, %16, %32 : vector<8x1xi1>, vector<8x1xf32>
    %34 = arith.addf %31, %33 : vector<8x1xf32>
    %c0_11 = arith.constant 0 : index
    %c0_12 = arith.constant 0 : index
    %35 = vector.load %arg5[%c0_11, %c0_12] : memref<8x1xf32, #tpu.memory_space<vmem>>, vector<8x1xf32>
    tpu.vector_store %arg5[%c0_11, %c0_12], %34 {strides = array<i32>} : memref<8x1xf32, #tpu.memory_space<vmem>>, vector<8x1xf32>,
    %c0_13 = arith.constant 0 : index
    %c0_14 = arith.constant 0 : index
    %36 = vector.load %arg6[%c0_13, %c0_14] : memref<8x1xf32, #tpu.memory_space<vmem>>, vector<8x1xf32>
    %cst_15 = arith.constant 1.000000e+00 : f32
    %37 = vector.broadcast %cst_15 : f32 to vector<8x1xf32>
    %38 = arith.subf %37, %30 : vector<8x1xf32>
    %cst_16 = arith.constant 0.000000e+00 : f32
    %39 = vector.broadcast %cst_16 : f32 to vector<8x1xf32>
    %40 = arith.select %12, %38, %39 : vector<8x1xi1>, vector<8x1xf32>
    %41 = arith.addf %36, %40 : vector<8x1xf32>
    %c0_17 = arith.constant 0 : index
    %c0_18 = arith.constant 0 : index
    %42 = vector.load %arg6[%c0_17, %c0_18] : memref<8x1xf32, #tpu.memory_space<vmem>>, vector<8x1xf32>
    tpu.vector_store %arg6[%c0_17, %c0_18], %41 {strides = array<i32>} : memref<8x1xf32, #tpu.memory_space<vmem>>, vector<8x1xf32>,
    %c0_i32_19 = arith.constant 0 : i32
    %43 = arith.cmpi eq, %arg1, %c0_i32_19 : i32
    %44 = arith.extui %43 : i1 to i32
    %c0_i32_20 = arith.constant 0 : i32
    %45 = arith.cmpi ne, %44, %c0_i32_20 : i32
    scf.if %45 {
      %c0_21 = arith.constant 0 : index
      %c0_22 = arith.constant 0 : index
      %46 = vector.load %arg5[%c0_21, %c0_22] : memref<8x1xf32, #tpu.memory_space<vmem>>, vector<8x1xf32>
      %47 = vector.shape_cast %46 : vector<8x1xf32> to vector<1x8x1xf32>
      %cst_23 = arith.constant dense<0.000000e+00> : vector<1xf32>
      %48 = vector.multi_reduction <add>, %47, %cst_23 [1, 2] : vector<1x8x1xf32> to vector<1xf32>
      %49 = vector.shape_cast %48 : vector<1xf32> to vector<1x1x1xf32>
      %50 = vector.extract %49[0, 0, 0] : f32 from vector<1x1x1xf32>
      %c0_24 = arith.constant 0 : index
      %c0_25 = arith.constant 0 : index
      %51 = vector.load %arg6[%c0_24, %c0_25] : memref<8x1xf32, #tpu.memory_space<vmem>>, vector<8x1xf32>
      %52 = vector.shape_cast %51 : vector<8x1xf32> to vector<1x8x1xf32>
      %cst_26 = arith.constant dense<0.000000e+00> : vector<1xf32>
      %53 = vector.multi_reduction <add>, %52, %cst_26 [1, 2] : vector<1x8x1xf32> to vector<1xf32>
      %54 = vector.shape_cast %53 : vector<1xf32> to vector<1x1x1xf32>
      %55 = vector.extract %54[0, 0, 0] : f32 from vector<1x1x1xf32>
      %56 = tpu.iota {dimensions = array<i32: 1>} : vector<1x8x128xi32>
      %c0_i32_27 = arith.constant 0 : i32
      %57 = vector.broadcast %c0_i32_27 : i32 to vector<1x8x128xi32>
      %58 = arith.cmpi eq, %56, %57 : vector<1x8x128xi32>
      %c1_i32_28 = arith.constant 1 : i32
      %59 = vector.broadcast %c1_i32_28 : i32 to vector<1x8x128xi32>
      %60 = arith.cmpi eq, %56, %59 : vector<1x8x128xi32>
      %cst_29 = arith.constant 0.000000e+00 : f32
      %61 = vector.broadcast %55 : f32 to vector<1x8x128xf32>
      %62 = vector.broadcast %cst_29 : f32 to vector<1x8x128xf32>
      %63 = arith.select %60, %61, %62 : vector<1x8x128xi1>, vector<1x8x128xf32>
      %64 = vector.broadcast %50 : f32 to vector<1x8x128xf32>
      %65 = arith.select %58, %64, %63 : vector<1x8x128xi1>, vector<1x8x128xf32>
      %c0_30 = arith.constant 0 : index
      %c0_31 = arith.constant 0 : index
      %c0_32 = arith.constant 0 : index
      %66 = vector.load %arg4[%c0_30, %c0_31, %c0_32] : memref<1x8x128xf32, #tpu.memory_space<vmem>>, vector<1x8x128xf32>
      tpu.vector_store %arg4[%c0_30, %c0_31, %c0_32], %65 {strides = array<i32>} : memref<1x8x128xf32, #tpu.memory_space<vmem>>, vector<1x8x128xf32>,
    } else {
    }
    return
  }
  func.func @transform_0(%arg0: i32, %arg1: i32) -> (i32, i32) {
    %c1_i32 = arith.constant 1 : i32
    %0 = arith.muli %arg0, %c1_i32 : i32
    %1 = arith.addi %0, %arg1 : i32
    %c1_i32_0 = arith.constant 1 : i32
    %2 = arith.minsi %1, %c1_i32_0 : i32
    %c0_i32 = arith.constant 0 : i32
    %c0_i32_1 = arith.constant 0 : i32
    return %2, %c0_i32 : i32, i32
  }
  func.func @transform_1(%arg0: i32, %arg1: i32) -> (i32, i32) {
    %c1_i32 = arith.constant 1 : i32
    %0 = arith.muli %arg0, %c1_i32 : i32
    %1 = arith.addi %0, %arg1 : i32
    %c1_i32_0 = arith.constant 1 : i32
    %2 = arith.minsi %1, %c1_i32_0 : i32
    %c0_i32 = arith.constant 0 : i32
    %c0_i32_1 = arith.constant 0 : i32
    return %2, %c0_i32 : i32, i32
  }
  func.func @transform_2(%arg0: i32, %arg1: i32) -> (i32, i32, i32) {
    %c0_i32 = arith.constant 0 : i32
    %c0_i32_0 = arith.constant 0 : i32
    %c0_i32_1 = arith.constant 0 : i32
    return %arg0, %c0_i32, %c0_i32_0 : i32, i32, i32
  }
}

</mosaic_0001>

<bundles_post_ra>
// kernel: tpu_custom_call.1
= control target key start
LH: loop header
LB: loop body
LE: loop exit
PB: predicated region body
PF: predicated region fallthrough
CT: control target
= control target key end

     0   :  { %7 = vsyncpa [#allocation5], 0  ;;  %s988_s0 = inlined_call_operand.hbm [shape: f32[16,128], index: 0, kind: input, shape index: {}]   ;;  %s989_s1 = inlined_call_operand.hbm [shape: f32[16,128], index: 1, kind: input, shape index: {}]   ;;  %s990_s2 = inlined_call_operand.hbm [shape: f32[2,8,128], index: 2, kind: output, shape index: {}]  }
   0x1   :  { %9 = vsyncpa [#allocation5 + $0x1], 0 }
   0x2   :  { %10 = vsyncpa [#allocation8], 0 }
   0x3   :  { %12 = vsyncpa [#allocation8 + $0x1], 0 }
   0x4   :  { %13 = vsyncpa [#allocation6], 0 }
   0x5   :  { %15 = vsyncpa [#allocation6 + $0x1], 0  ;;  %s728_s9 = smov 0   ;;  %s730_s10 = smov 0  }
   0x6   :  { %s732_s11 = smov 0   ;;  %s734_s12 = smov 0  }
   0x7   :  { %s736_s13 = smov 0   ;;  %s738_s14 = smov 0  }
   0x8   :  { %s740_s15 = smov 0   ;;  %s742_s16 = smov 0  }
   0x9   :  { %s744_s17 = smov 0  }
   0xa LB: > { %s422_s18 = sadd.s32 4294967295, %s707_s17   ;;  %s423_s19 = sadd.s32 4294967294, %s707_s17   ;;  %s707_s17 = sphi %s744_s17, %s21_s17   ;;  %s703_s16 = sphi %s742_s16, %s1015_s16   ;;  %s699_s15 = sphi %s740_s15, %s1014_s15   ;;  %s695_s14 = sphi %s738_s14, %s1013_s14   ;;  %s691_s13 = sphi %s736_s13, %s1012_s13   ;;  %s687_s12 = sphi %s734_s12, %s1011_s12   ;;  %s683_s11 = sphi %s732_s11, %s1010_s11   ;;  %s679_s10 = sphi %s730_s10, %s1009_s10   ;;  %s675_s9 = sphi %s728_s9, %s1008_s9  }
   0xb   : > { %s33_s20 = sadd.s32 1, %s703_s16  ;;  %p38_p0 = scmp.lt.s32.totalorder %s703_s16, 1 }
   0xc   : > { %p35_p1 = scmp.ge.s32.totalorder %s33_s20, 2  ;;  %s46_s21 = sadd.s32 1, %s695_s14 }
   0xd   : > { %s777_s22 = scalar_select %p38_p0, %s703_s16, 1 }
   0xe   : > { %s1017_s20 = smov (%p35_p1, %s33_s20), 0  ;;  %p53_p2 = scmp.ne.s32.totalorder %s695_s14, %s691_s13 }
   0xf   : > { %p54_p3 = scmp.eq.s32.totalorder %s707_s17, 0  ;;  %p41_p4 = scmp.lt.s32.totalorder %s1017_s20, 1 }
  0x10   : > { %p59_p5 = scmp.ne.s32.totalorder %s691_s13, %s687_s12  ;;  %p60_p7 = scmp.eq.s32.totalorder %s422_s18, 0 }
  0x11   : > { %p786_p6 = por %p54_p3, %p53_p2  ;;  %s101_s26 = ssub.s32 %s703_s16, %s1017_s20 }
  0x12   : > { %s42_s24 = scalar_select %p41_p4, %s1017_s20, 1 }
  0x13   : > { %p791_p8 = por %p60_p7, %p59_p5  ;;  %p102_p9 = scmp.eq.s32.totalorder %s101_s26, 0 }
  0x14   : > { %s43_s27 = ssub.s32 %s777_s22, %s42_s24  ;;  %s104_s28 = sadd.s32 1, %s683_s11 }
  0x15   : > { %s995_s25 = scalar_select %p791_p8, 1, 0 }
  0x16   : > { %p44_p10 = scmp.eq.s32.totalorder %s43_s27, 0  ;;  %p114_p11 = scmp.ne.s32.totalorder %s683_s11, %s679_s10 }
  0x17   : > { %s800_s29 = scalar_select %p102_p9, %s683_s11, %s104_s28  }
  0x18   : > { %s803_s30 = scalar_select %p44_p10, %s695_s14, %s46_s21  }
  0x19   : > { %p115_p12 = scmp.eq.s32.totalorder %s422_s18, 1  ;;  %p120_p13 = scmp.ne.s32.totalorder %s679_s10, %s675_s9 }
  0x1a   : > { %p121_p0 = scmp.eq.s32.totalorder %s423_s19, 1  ;;  %p460_p4 = scmp.lt.s32.totalorder %s707_s17, 2 }
  0x1b   : > { %p809_p1 = por %p115_p12, %p114_p11  ;;  %s820_s5 = sand.u32 1, %s695_s14  }
  0x1c   : > { %p814_p3 = por %p121_p0, %p120_p13  ;;  %s427_s6 = sshll.u32 %s777_s22, 7 }
  0x1d   : > { %s996_s3 = scalar_select %p809_p1, 1, 0 }
  0x1e   : > { %s997_s4 = scalar_select %p814_p3, 1, 0 }
  0x1f   : > { %s991_s7 = sshll.u32 %s820_s5, 3  ;;  %s829_s18 = scalar_lea.hbm %s988_s0, %s427_s6 }
  0x20   : > { %s145_s19 = scalar_lea.vmem [#allocation4], %s991_s7  ;;  %p835_p5 = pnand %p460_p4, %p786_p6 }
  0x21   : > { %s155_s21 = sshll.u32 %s145_s19, 4  ;;  %s142_s26 = scalar_lea.sflag [#allocation5], %s820_s5  ;;  %s839_s21 = int_to_ptr.vmem [resolvable:$true] %s155_s21 }
  0x22   : > { %s537_s27 = scalar_lea.hbm %s829_s18, 128  ;;  %p539_p11 = pneg %p835_p5 }
  0x23   : > { %p538_p10 = scmp.ne.s32.totalorder %s829_s18, %s537_s27  ;;  %s542_s8 = scalar_lea.hbm %s988_s0, 256 }
  0x24   : > { %p543_p6 = scmp.lt.u32.totalorder %s829_s18, %s988_s0  ;;  %p544_p0 = scmp.lt.u32.totalorder %s542_s8, %s537_s27 }
  0x25   : > { %p540_p12 = pnand %p539_p11, %p538_p10  ;;  %p546_p2 = scmp.lt.u32.totalorder %s537_s27, %s829_s18 }
  0x26   : > { %p545_p4 = por %p544_p0, %p543_p6 }
  0x27   : > { %p541_p13 = pneg %p540_p12 }
  0x28   : > { %p547_p7 = por %p546_p2, %p545_p4 }
  0x2a   : > { %p548_p9 = pnand %p547_p7, %p541_p13 }
  0x2c   : > { %551 = shalt.err (!%p548_p9)
}
  0x2d   : > { %s552_s7 = scalar_lea.vmem %s839_s21, 128  ;;  %s709_s23 = smov [#allocation4]  }
  0x2e   : > { %p553_p10 = scmp.ne.s32.totalorder %s839_s21, %s552_s7  ;;  %s557_s28 = sshll.u32 %s709_s23, 4  ;;  %s558_s28 = int_to_ptr.vmem [resolvable:$false] %s557_s28 }
  0x2f   : > { %s559_s12 = scalar_lea.vmem %s558_s28, 256  ;;  %p560_p1 = scmp.lt.s32.totalorder %s839_s21, %s558_s28 }
  0x30   : > { %p555_p12 = pnand %p553_p10, %p539_p11  ;;  %p561_p6 = scmp.lt.s32.totalorder %s559_s12, %s552_s7 }
  0x32   : > { %p556_p3 = pneg %p555_p12  ;;  %p562_p0 = por %p561_p6, %p560_p1 }
  0x34   : > { %p563_p2 = pnand %p562_p0, %p556_p3 }
  0x36   : > { %566 = shalt.err (!%p563_p2)
}
  0x37   : > { %452 = dma.hbm_to_vmem [thread:$0]  (!%p835_p5), %s829_s18, 128, %s839_s21, %s142_s26  }
  0x38   : > { %p999_p7 = scmp.lt.s32.totalorder %s707_s17, 3  ;;  %p1000_p9 = scmp.ge.s32.totalorder %s707_s17, 1 }
  0x39   : > { %s882_s19 = scalar_lea.hbm %s989_s1, %s427_s6  ;;  %s1002_s23 = sshll.u32 %s820_s5, 3 }
  0x3a   : > { %p873_p13 = pnand %p1000_p9, %p999_p7  ;;  %s166_s28 = scalar_lea.vmem [#allocation7], %s1002_s23 }
  0x3b   : > { %s176_s12 = sshll.u32 %s166_s28, 4  ;;  %s163_s18 = scalar_lea.sflag [#allocation8], %s820_s5  ;;  %s177_s12 = int_to_ptr.vmem [resolvable:$true] %s176_s12 }
  0x3c   : > { %s1001_s27 = scalar_select %p873_p13, 1, 0 }
  0x3d   : > { %s567_s21 = scalar_lea.hbm %s882_s19, 128  ;;  %s572_s6 = scalar_lea.hbm %s989_s1, 256 }
  0x3e   : > { %p568_p1 = scmp.ne.s32.totalorder %s882_s19, %s567_s21  ;;  %p573_p10 = scmp.lt.u32.totalorder %s882_s19, %s989_s1 }
  0x3f   : > { %p574_p12 = scmp.lt.u32.totalorder %s572_s6, %s567_s21  ;;  %p576_p0 = scmp.lt.u32.totalorder %s567_s21, %s882_s19 }
  0x40   : > { %p570_p3 = pnand %p568_p1, %p539_p11 }
  0x41   : > { %p575_p6 = por %p574_p12, %p573_p10 }
  0x42   : > { %p571_p4 = pneg %p570_p3 }
  0x43   : > { %p577_p2 = por %p576_p0, %p575_p6 }
  0x45   : > { %p578_p7 = pnand %p577_p2, %p571_p4 }
  0x47   : > { %581 = shalt.err (!%p578_p7)
}
  0x48   : > { %s582_s5 = scalar_lea.vmem %s177_s12, 128  ;;  %s710_s23 = smov [#allocation7]  }
  0x49   : > { %p583_p9 = scmp.ne.s32.totalorder %s177_s12, %s582_s5  ;;  %s587_s28 = sshll.u32 %s710_s23, 4  ;;  %s588_s28 = int_to_ptr.vmem [resolvable:$false] %s587_s28 }
  0x4a   : > { %s589_s22 = scalar_lea.vmem %s588_s28, 256  ;;  %p590_p8 = scmp.lt.s32.totalorder %s177_s12, %s588_s28 }
  0x4b   : > { %p585_p1 = pnand %p583_p9, %p539_p11  ;;  %p591_p13 = scmp.lt.s32.totalorder %s589_s22, %s582_s5 }
  0x4d   : > { %p586_p3 = pneg %p585_p1  ;;  %p592_p10 = por %p591_p13, %p590_p8 }
  0x4f   : > { %p593_p12 = pnand %p592_p10, %p586_p3 }
  0x51   : > { %596 = shalt.err (!%p593_p12)
}
  0x52   : > { %455 = dma.hbm_to_vmem [thread:$0]  (!%p835_p5), %s882_s19, 128, %s177_s12, %s163_s18  }
  0x53   : > { %p1003_p4 = scmp.ne.s32.totalorder %s1001_s27, 0 }
  0x54   : > { %s187_s21 = sand.u32 (!%p1003_p4), 1, %s691_s13   ;;  %p1004_p11 = scmp.ne.s32.totalorder (!%p1003_p4), %s995_s25, 0 }
  0x55   : > { %185 = sbr.rel (%p1003_p4) target bundleno = 496 (0x1f0), region = 28  ;;  %s431_s26 = sshll.u32 (!%p1003_p4), %s187_s21, 3 }
  0x56   : > { %s188_s6 = scalar_lea.sflag (!%p1003_p4), [#allocation5], %s187_s21  ;;  %s191_s7 = scalar_lea.vmem (!%p1003_p4), [#allocation4], %s431_s26 }
  0x5c   : > { %662 = dma.done.wait (%p1004_p11), %s188_s6, 128  }
  0x5d   : > { %664 = vsyncadd (%p1004_p11), %s188_s6, 4294967168  ;;  %s197_s8 = scalar_lea.sflag [#allocation8], %s187_s21  ;;  %s200_s5 = scalar_lea.vmem [#allocation7], %s431_s26 }
  0x5e   : > { %666 = dma.done.wait (%p1004_p11), %s197_s8, 128  }
  0x5f   : > { %668 = vsyncadd (%p1004_p11), %s197_s8, 4294967168  ;;  %v239_v0 = vld [vmem:[%s191_s7] sm:$0xff]  ;;  %v240_v1 = vld [vmem:[%s200_s5] sm:$0xff]  ;;  %vm236_vm0 = vcmask 7168   ;;  %v711_v7 = vmov 0.0   ;;  %v243_v8 = vlaneseq  ;;  %s434_s25 = sshll.u32 %s699_s15, 3 }
  0x60   : > { %v255_v2 = vmul.f32 %v239_v0, %v239_v0  ;;  %v252_v3 = vmul.f32 %v240_v1, %v239_v0  ;;  %v248_v4 = vsub.f32 %v239_v0, %v240_v1  ;;  %v258_v5 = vmul.f32 %v240_v1, %v240_v1  ;;  %237 = vst.msk [vmem:[#allocation2] sm:$0xff] %vm236_vm0, %v711_v7  ;;  %s223_s24 = sand.u32 1, %s679_s10   ;;  %s436_s19 = sshll.u32 %s699_s15, 7 }
  0x61   : > { %238 = vst.msk [vmem:[#allocation3] sm:$0xff] %vm236_vm0, %v711_v7  ;;  %v244_v9 = vshrl.u32 %v243_v8, 7  ;;  %v245_v10 = vstv %s434_s25  ;;  %s433_s27 = sshll.u32 %s223_s24, 3  ;;  %s931_s26 = scalar_lea.hbm %s990_s2, %s436_s19 }
  0x62   : > { %256 = vadd.xlane.f32.xlu0 %v255_v2  ;;  %253 = vadd.xlane.f32.xlu1 %v252_v3  ;;  %v249_v6 = vmul.f32 %v248_v4, %v248_v4  ;;  %s225_s18 = scalar_lea.vmem [#allocation9], %s433_s27  ;;  %s308_s15 = scalar_lea.sflag [#allocation6], %s223_s24 }
  0x63   : > { %v246_v11 = vadd.s32 %v245_v10, %v244_v9  ;;  %vm301_vm2 = vcmp.eq.s32.totalorder %v244_v9, 1  ;;  %s321_s23 = sshll.u32 %s225_s18, 4  ;;  %vm300_vm3 = vcmp.eq.s32.totalorder %v244_v9, 0  ;;  %p1005_p5 = scmp.ne.s32.totalorder %s996_s3, 0  ;;  %s933_s23 = int_to_ptr.vmem [resolvable:$true] %s321_s23 }
  0x64   : > { %s597_s6 = scalar_lea.vmem %s933_s23, 128  ;;  %s712_s7 = smov [#allocation9]  }
  0x65   : > { %vm247_vm1 = vcmp.lt.s32.totalorder %v246_v11, 16  ;;  %p598_p8 = scmp.ne.s32.totalorder %s933_s23, %s597_s6  ;;  %s601_s8 = sshll.u32 %s712_s7, 4  ;;  %s602_s8 = int_to_ptr.vmem [resolvable:$false] %s601_s8 }
  0x66   : > { %259 = vadd.xlane.f32.xlu0 %v258_v5  ;;  %250 = vadd.xlane.f32.xlu1 %v249_v6  ;;  %s603_s5 = scalar_lea.vmem %s602_s8, 256  ;;  %p604_p0 = scmp.lt.s32.totalorder %s933_s23, %s602_s8 }
  0x67   : > { %v265_v14 = vld [vmem:[#allocation2] sm:$0xff]  ;;  %p599_p13 = pnand %p598_p8, %p1005_p5  ;;  %p605_p2 = scmp.lt.s32.totalorder %s603_s5, %s597_s6 }
  0x68   : > { %v270_v26 = vld [vmem:[#allocation3] sm:$0xff] }
  0x69   : > { %p600_p6 = pneg %p599_p13  ;;  %p606_p7 = por %p605_p2, %p604_p0 }
  0x6b   : > { %p607_p9 = pnand %p606_p7, %p600_p6 }
  0xef   : > { %v257_v12 = vpop.xlane.xlu0 %256  ;;  %v254_v13 = vpop.xlane.xlu1 %253 }
  0xf3   : > { %v260_v15 = vpop.xlane.xlu0 %259  ;;  %v251_v16 = vpop.xlane.xlu1 %250 }
  0xf4   : > { %v261_v17 = vmul.f32 %v260_v15, %v257_v12  ;;  %v266_v18 = vsel %vm247_vm1, %v251_v16, 0.0 }
  0xf5   : > { %v267_v19 = vadd.f32 %v266_v18, %v265_v14 }
  0xf6   : > { %v262_v20 = vmax.f32 %v261_v17, 1e-16 }
  0xf7   : > { %269 = vst.msk [vmem:[#allocation2] sm:$0xff] %vm236_vm0, %v267_v19 }
  0xf8   : > { %535 = vrsqrt.f32 %v262_v20 }
  0xfe   : > { %v278_v21 = vld [vmem:[#allocation2] sm:$0xff] }
  0xff   : > { %v279_v22 = vsel %vm236_vm0, %v278_v21, 0.0 }
 0x100   : > { %280 = vadd.xlane.f32.xlu0 %v279_v22 }
 0x102   : > { %v536_v23 = vpop.eup %535 }
 0x103   : > { %v264_v24 = vmul.f32 %v536_v23, %v254_v13 }
 0x105   : > { %v271_v25 = vsub.f32 1.0, %v264_v24 }
 0x107   : > { %v272_v27 = vsel %vm247_vm1, %v271_v25, 0.0 }
 0x108   : > { %v273_v28 = vadd.f32 %v272_v27, %v270_v26 }
 0x10a   : > { %274 = vst.msk [vmem:[#allocation3] sm:$0xff] %vm236_vm0, %v273_v28 }
 0x111   : > { %v289_v29 = vld [vmem:[#allocation3] sm:$0xff] }
 0x112   : > { %v290_v30 = vsel %vm236_vm0, %v289_v29, 0.0 }
 0x113   : > { %291 = vadd.xlane.f32.xlu1 %v290_v30 }
 0x18d   : > { %v281_v31 = vpop.xlane.xlu0 %280 }
 0x18e   : > { %v282_v32 = vrot.slane %v281_v31, 4 }
 0x190   : > { %v283_v33 = vadd.f32 %v282_v32, %v281_v31 }
 0x192   : > { %v284_v34 = vrot.slane %v283_v33, 2 }
 0x194   : > { %v285_v35 = vadd.f32 %v284_v34, %v283_v33 }
 0x196   : > { %v286_v36 = vrot.slane %v285_v35, 1 }
 0x198   : > { %v287_v37 = vadd.f32 %v286_v36, %v285_v35 }
 0x19a   : > { %439 = vpush %v287_v37 }
 0x1a0   : > { %v292_v38 = vpop.xlane.xlu1 %291 }
 0x1a1   : > { %v293_v39 = vrot.slane %v292_v38, 4 }
 0x1a3   : > { %v294_v40 = vadd.f32 %v293_v39, %v292_v38 }
 0x1a5   : > { %v295_v41 = vrot.slane %v294_v40, 2 }
 0x1a7   : > { %v296_v42 = vadd.f32 %v295_v41, %v294_v40 }
 0x1a9   : > { %v297_v43 = vrot.slane %v296_v42, 1 }
 0x1ab   : > { %v298_v44 = vadd.f32 %v297_v43, %v296_v42 }
 0x1ad   : > { %441 = vpush %v298_v44 }
 0x1cb   : > { %s440_s12 = spop %439 }
 0x1cc   : > { %v304_v46 = vstv %s440_s12 }
 0x1de   : > { %s442_s28 = spop %441 }
 0x1df   : > { %v302_v45 = vstv %s442_s28 }
 0x1e0   : > { %v303_v47 = vsel %vm301_vm2, %v302_v45, 0.0 }
 0x1e1   : > { %v305_v48 = vsel %vm300_vm3, %v304_v46, %v303_v47 }
 0x1e2   : > { %306 = vst [vmem:[%s225_s18] sm:$0xff] %v305_v48 }
 0x1e3   : > { %610 = shalt.err (!%p607_p9)
}
 0x1e4   : > { %s611_s25 = scalar_lea.hbm %s931_s26, 128  ;;  %s615_s19 = scalar_lea.hbm %s990_s2, 256 }
 0x1e5   : > { %p612_p1 = scmp.ne.s32.totalorder %s931_s26, %s611_s25  ;;  %p616_p12 = scmp.lt.u32.totalorder %s931_s26, %s990_s2 }
 0x1e6   : > { %p617_p4 = scmp.lt.u32.totalorder %s615_s19, %s611_s25  ;;  %p619_p8 = scmp.lt.u32.totalorder %s611_s25, %s931_s26 }
 0x1e7   : > { %p613_p3 = pnand %p612_p1, %p1005_p5 }
 0x1e8   : > { %p618_p11 = por %p617_p4, %p616_p12 }
 0x1e9   : > { %p614_p10 = pneg %p613_p3 }
 0x1ea   : > { %p620_p13 = por %p619_p8, %p618_p11 }
 0x1ec   : > { %p621_p6 = pnand %p620_p13, %p614_p10 }
 0x1ee   : > { %624 = shalt.err (!%p621_p6)
}
 0x1ef   : > { %447 = dma.vmem_to_hbm [thread:$0]  (%p1005_p5), %s933_s23, 128, %s931_s26, %s308_s15  }
 0x1f0 PF: > { %s333_s28 = sand.u32 1, %s675_s9   ;;  %p1006_p0 = scmp.ne.s32.totalorder %s997_s4, 0 }
 0x1f1   : > { %p1007_p2 = scmp.ge.s32.totalorder %s707_s17, 2  ;;  %s334_s22 = scalar_lea.sflag [#allocation6], %s333_s28 }
 0x1f3   : > { %p457_p7 = pnand %p1007_p2, %p1006_p0 }
 0x1f5   : > { %670 = dma.done.wait (!%p457_p7), %s334_s22, 128  }
 0x1f6   : > { %672 = vsyncadd (!%p457_p7), %s334_s22, 4294967168  ;;  %s21_s17 = sadd.s32 1, %s707_s17   ;;  %s1008_s9 = smov %s679_s10 }
 0x1f7   : > { %p18_p9 = scmp.ge.s32.totalorder %s21_s17, 4   ;;  %s1009_s10 = smov %s683_s11 }
 0x1f8   : > { %s1010_s11 = smov %s800_s29  ;;  %s1011_s12 = smov %s691_s13 }
 0x1f9   : > { %s1012_s13 = smov %s695_s14  ;;  %s1013_s14 = smov %s803_s30 }
 0x1fa   : > { %s1014_s15 = smov %s703_s16  ;;  %s1015_s16 = smov %s1017_s20 }
 0x1fb   :  { %20 = sbr.rel (!%p18_p9) target bundleno = 10 (0xa), region = 94 }
 0x202   :  { %339 = vsyncpa [#allocation5], 1 }
 0x203   :  { %341 = vsyncpa [#allocation5 + $0x1], 1 }
 0x204   :  { %342 = vsyncpa [#allocation8], 1 }
 0x205   :  { %344 = vsyncpa [#allocation8 + $0x1], 1 }
 0x206   :  { %345 = vsyncpa [#allocation6], 1 }
 0x207   :  { %347 = vsyncpa [#allocation6 + $0x1], 1 }

</bundles_post_ra>
